<compile_context>
chip_gen: v5e
topology: v5e:2x2
jax: 0.10.0
libtpu: 0.0.40
codegen_flags: <defaults>
</compile_context>

<pallas_src>
import functools
import math

import jax
import jax.numpy as jnp
from jax import lax
from jax.experimental import pallas as pl
from jax.experimental.pallas import tpu as pltpu

_BN_EPS = 1e-5
_VMEM_LIMIT = 32 * 1024 * 1024  # safe on v5e/v6e/v7x; per-step tiles are << this


# ----------------------------------------------------------------------------
# small helpers
# ----------------------------------------------------------------------------
def _round_up(x, m):
    return ((x + m - 1) // m) * m


def _pick_row_tile(rows):
    tr = min(512, rows)
    while rows % tr:
        tr //= 2
    return tr


def _pick_div_tile(size):
    for c in (512, 256, 128):
        if size % c == 0:
            return c
    return size


# ----------------------------------------------------------------------------
# Kernel 1: tiled matmul (+ optional BN partial statistics)
# ----------------------------------------------------------------------------
def _make_matmul_kernel(emit_stats):
    def kernel(a_ref, b_ref, y_ref, *rest):
        if emit_stats:
            stats_ref, acc_ref = rest
        else:
            (acc_ref,) = rest
        k = pl.program_id(2)

        @pl.when(k == 0)
        def _init():
            acc_ref[...] = jnp.zeros_like(acc_ref)

        acc_ref[...] += jnp.dot(a_ref[...], b_ref[...],
                                preferred_element_type=jnp.float32)

        @pl.when(k == pl.num_programs(2) - 1)
        def _finish():
            acc = acc_ref[...]
            y_ref[...] = acc
            if emit_stats:
                # Padded rows of A are zero so they contribute 0 to both sums;
                # the finalize in glue divides by the *real* row count.
                s = jnp.sum(acc, axis=0, keepdims=True)
                ss = jnp.sum(acc * acc, axis=0, keepdims=True)
                pad = jnp.zeros((6, acc.shape[1]), jnp.float32)
                stats_ref[...] = jnp.concatenate([s, ss, pad], axis=0)

    return kernel


@functools.partial(jax.jit, static_argnames=("emit_stats",))
def _tiled_matmul(a, b, *, emit_stats):
    """a:(M,K), b:(K,N) -> y:(Mpad,Npad) f32 [+ per-M-tile BN partial sums]."""
    m, k = a.shape
    nn = b.shape[1]
    kpad = _round_up(k, 128)
    npad = _round_up(nn, 128)
    tm = _round_up(m, 8) if m <= 512 else 512
    mpad = _round_up(m, tm)
    tk = _pick_div_tile(kpad)
    tn = npad if npad <= 512 else _pick_div_tile(npad)

    a_p = jnp.pad(a.astype(jnp.bfloat16), ((0, mpad - m), (0, kpad - k)))
    b_p = jnp.pad(b.astype(jnp.bfloat16), ((0, kpad - k), (0, npad - nn)))
    gm, gn, gk = mpad // tm, npad // tn, kpad // tk

    out_shape = [jax.ShapeDtypeStruct((mpad, npad), jnp.float32)]
    out_specs = [pl.BlockSpec((tm, tn), lambda i, j, kk: (i, j))]
    if emit_stats:
        out_shape.append(jax.ShapeDtypeStruct((gm * 8, npad), jnp.float32))
        out_specs.append(pl.BlockSpec((8, tn), lambda i, j, kk: (i, j)))

    res = pl.pallas_call(
        _make_matmul_kernel(emit_stats),
        grid=(gm, gn, gk),
        in_specs=[pl.BlockSpec((tm, tk), lambda i, j, kk: (i, kk)),
                  pl.BlockSpec((tk, tn), lambda i, j, kk: (kk, j))],
        out_specs=out_specs,
        out_shape=out_shape,
        scratch_shapes=[pltpu.VMEM((tm, tn), jnp.float32)],
        compiler_params=pltpu.CompilerParams(
            dimension_semantics=("parallel", "parallel", "arbitrary"),
            vmem_limit_bytes=_VMEM_LIMIT),
        cost_estimate=pl.CostEstimate(
            flops=2 * mpad * kpad * npad,
            transcendentals=0,
            bytes_accessed=(mpad * kpad + kpad * npad) * 2 + mpad * npad * 4),
    )(a_p, b_p)
    if emit_stats:
        y, stats = res
        return y, stats.reshape(gm, 8, npad)
    return res[0]


# ----------------------------------------------------------------------------
# Kernel 2: 3x3 stride-1 conv, no materialized im2col (flat tap offsets)
# ----------------------------------------------------------------------------
def _make_conv3x3_kernel(tm, wp, win):
    def kernel(x_hbm, w_ref, y_ref, a_buf, sem):
        b = pl.program_id(0)
        i = pl.program_id(1)
        start = pl.multiple_of(i * tm, 8)
        cp = pltpu.make_async_copy(x_hbm.at[b, pl.ds(start, win), :], a_buf, sem)
        cp.start()
        cp.wait()
        # TODO(synk): double-buffer this window DMA across grid steps.
        acc = None
        for di in range(3):
            for dj in range(3):
                off = di * wp + dj
                part = jnp.dot(a_buf[off:off + tm, :], w_ref[di * 3 + dj],
                               preferred_element_type=jnp.float32)
                acc = part if acc is None else acc + part
        y_ref[0] = acc

    return kernel


@jax.jit
def _conv3x3_s1(x, w):
    """3x3, stride 1, padding 1 conv.

    The spatially padded input is flattened so each of the nine taps is a pure
    row offset; one contiguous row window per output tile is DMA'd to VMEM and
    the taps are static slices of it -> no 9x im2col tensor in HBM."""
    n, h, wd, cin = x.shape
    cout = w.shape[3]
    wp = wd + 2
    cpad = _round_up(cout, 128)
    l_valid = h * wp
    tm = _round_up(l_valid, 8) if l_valid <= 512 else 512
    l_pad = _round_up(l_valid, tm)
    win = tm + 2 * wp + 2
    lp_total = l_pad + 2 * wp + 8

    xp = jnp.pad(x, ((0, 0), (1, 1), (1, 1), (0, 0)))
    xf = xp.reshape(n, (h + 2) * wp, cin)
    xf = jnp.pad(xf, ((0, 0), (0, lp_total - (h + 2) * wp), (0, 0)))
    xf = xf.astype(jnp.bfloat16)
    wb = jnp.pad(w, ((0, 0), (0, 0), (0, 0), (0, cpad - cout)))
    wb = wb.reshape(9, cin, cpad).astype(jnp.bfloat16)

    gm = l_pad // tm
    return pl.pallas_call(
        _make_conv3x3_kernel(tm, wp, win),
        grid=(n, gm),
        in_specs=[pl.BlockSpec(memory_space=pl.ANY),
                  pl.BlockSpec((9, cin, cpad), lambda b, i: (0, 0, 0))],
        out_specs=pl.BlockSpec((1, tm, cpad), lambda b, i: (b, i, 0)),
        out_shape=jax.ShapeDtypeStruct((n, l_pad, cpad), jnp.float32),
        scratch_shapes=[pltpu.VMEM((win, cin), jnp.bfloat16),
                        pltpu.SemaphoreType.DMA(())],
        compiler_params=pltpu.CompilerParams(
            dimension_semantics=("parallel", "parallel"),
            vmem_limit_bytes=_VMEM_LIMIT),
        cost_estimate=pl.CostEstimate(
            flops=2 * n * l_pad * 9 * cin * cpad,
            transcendentals=0,
            bytes_accessed=xf.size * 2 + wb.size * 2 + n * l_pad * cpad * 4),
    )(xf, wb)


# ----------------------------------------------------------------------------
# Kernel 3: tiled scale/shift (+ residual) (+ ReLU)
# ----------------------------------------------------------------------------
def _make_affine_kernel(add_res, relu):
    def kernel(*refs):
        if add_res:
            y_ref, sc_ref, sh_ref, r_ref, o_ref = refs
        else:
            y_ref, sc_ref, sh_ref, o_ref = refs
        v = y_ref[...] * sc_ref[...] + sh_ref[...]
        if add_res:
            v = v + r_ref[...]
        if relu:
            v = jnp.maximum(v, 0.0)
        o_ref[...] = v

    return kernel


@functools.partial(jax.jit, static_argnames=("relu",))
def _affine_residual_relu(y, scale, shift, residual, relu):
    """y:(rows,npad) f32, scale/shift:(1,npad), residual:None or (rows,npad)."""
    rows, npad = y.shape
    tr = _pick_row_tile(rows)
    args = [y, scale, shift]
    specs = [pl.BlockSpec((tr, npad), lambda i: (i, 0)),
             pl.BlockSpec((1, npad), lambda i: (0, 0)),
             pl.BlockSpec((1, npad), lambda i: (0, 0))]
    if residual is not None:
        args.append(residual)
        specs.append(pl.BlockSpec((tr, npad), lambda i: (i, 0)))
    return pl.pallas_call(
        _make_affine_kernel(residual is not None, relu),
        grid=(rows // tr,),
        in_specs=specs,
        out_specs=pl.BlockSpec((tr, npad), lambda i: (i, 0)),
        out_shape=jax.ShapeDtypeStruct((rows, npad), jnp.float32),
        compiler_params=pltpu.CompilerParams(
            dimension_semantics=("parallel",),
            vmem_limit_bytes=_VMEM_LIMIT),
    )(*args)


# ----------------------------------------------------------------------------
# Kernel 4: lane-dense multi-branch sum + ReLU (fuse layers)
# ----------------------------------------------------------------------------
def _make_sum_relu_kernel(n_in):
    def kernel(*refs):
        o_ref = refs[n_in]
        acc = refs[0][...]
        for i in range(1, n_in):
            acc = acc + refs[i][...]
        o_ref[...] = jnp.maximum(acc, 0.0)

    return kernel


@jax.jit
def _sum_relu(*tensors):
    shape = tensors[0].shape
    total = math.prod(shape)
    rows = _round_up(-(-total // 128), 8)
    padded = rows * 128
    tr = _pick_row_tile(rows)
    flats = [jnp.pad(t.reshape(-1), (0, padded - total)).reshape(rows, 128)
             for t in tensors]
    out = pl.pallas_call(
        _make_sum_relu_kernel(len(flats)),
        grid=(rows // tr,),
        in_specs=[pl.BlockSpec((tr, 128), lambda i: (i, 0))] * len(flats),
        out_specs=pl.BlockSpec((tr, 128), lambda i: (i, 0)),
        out_shape=jax.ShapeDtypeStruct((rows, 128), jnp.float32),
        compiler_params=pltpu.CompilerParams(
            dimension_semantics=("parallel",),
            vmem_limit_bytes=_VMEM_LIMIT),
    )(*flats)
    return out.reshape(-1)[:total].reshape(shape)


# ----------------------------------------------------------------------------
# conv + BN + (residual) + (ReLU) wrappers
# ----------------------------------------------------------------------------
def _extract_patches(x, ksize, stride, padding):
    """NHWC -> (N, Ho, Wo, k*k*C) bf16 patches.  Only used for the few
    stride-2 downsample convolutions (expansion 9/4 at half precision)."""
    x = x.astype(jnp.bfloat16)
    if padding > 0:
        x = jnp.pad(x, ((0, 0), (padding, padding), (padding, padding), (0, 0)))
    hp, wpp = x.shape[1], x.shape[2]
    ho = (hp - ksize) // stride + 1
    wo = (wpp - ksize) // stride + 1
    pieces = []
    for di in range(ksize):
        for dj in range(ksize):
            pieces.append(x[:, di:di + stride * ho:stride,
                            dj:dj + stride * wo:stride, :])
    return jnp.concatenate(pieces, axis=-1), ho, wo


def _conv3x3_s1_bn_act(x, w, gamma, beta, *, use_bn, relu, residual):
    n, h, wd, _ = x.shape
    cout = w.shape[3]
    wp = wd + 2
    cpad = _round_up(cout, 128)

    y3 = _conv3x3_s1(x, w)                 # (n, l_pad, cpad) f32
    l_pad = y3.shape[1]

    def _valid(t, ch):
        return t[:, :h * wp, :ch].reshape(n, h, wp, ch)[:, :, :wd, :]

    if use_bn:
        yv = _valid(y3, cout)
        m = n * h * wd
        mean = jnp.sum(yv, axis=(0, 1, 2)) / m
        var = jnp.sum(jnp.square(yv), axis=(0, 1, 2)) / m - jnp.square(mean)
        scale = gamma * lax.rsqrt(var + _BN_EPS)
        shift = beta - mean * scale
    else:
        scale = jnp.ones((cout,), jnp.float32)
        shift = jnp.zeros((cout,), jnp.float32)

    if use_bn or relu or residual is not None:
        rows = n * l_pad
        sc = jnp.pad(scale, (0, cpad - cout)).reshape(1, cpad)
        sh = jnp.pad(shift, (0, cpad - cout)).reshape(1, cpad)
        res2 = None
        if residual is not None:
            r = jnp.pad(residual,
                        ((0, 0), (0, 0), (0, wp - wd), (0, cpad - cout)))
            r = r.reshape(n, h * wp, cpad)
            r = jnp.pad(r, ((0, 0), (0, l_pad - h * wp), (0, 0)))
            res2 = r.reshape(rows, cpad)
        y2 = _affine_residual_relu(y3.reshape(rows, cpad), sc, sh, res2, relu)
        y3 = y2.reshape(n, l_pad, cpad)
    return _valid(y3, cout)


def conv_bn_act(x, w, gamma=None, beta=None, *, stride=1, padding=0,
                use_bn=True, relu=False, residual=None):
    kh, kw, cin, cout = w.shape
    n = x.shape[0]
    if gamma is None:
        gamma = jnp.ones((cout,), jnp.float32)
        beta = jnp.zeros((cout,), jnp.float32)

    if kh == 3 and stride == 1 and padding == 1:
        return _conv3x3_s1_bn_act(x, w, gamma, beta,
                                  use_bn=use_bn, relu=relu, residual=residual)

    # generic path: 1x1 direct (no im2col), or kxk/stride-2 via bf16 im2col
    if kh == 1 and padding == 0:
        xs = x[:, ::stride, ::stride, :] if stride > 1 else x
        ho, wo = xs.shape[1], xs.shape[2]
        a = xs.reshape(n * ho * wo, cin).astype(jnp.bfloat16)
    else:
        patches, ho, wo = _extract_patches(x, kh, stride, padding)
        a = patches.reshape(n * ho * wo, kh * kw * cin)
    b = w.reshape(kh * kw * cin, cout).astype(jnp.bfloat16)
    m = n * ho * wo

    if use_bn:
        y, stats = _tiled_matmul(a, b, emit_stats=True)
        psum = stats[:, 0, :cout].sum(axis=0)
        psumsq = stats[:, 1, :cout].sum(axis=0)
        mean = psum / m
        var = psumsq / m - mean * mean
        scale = gamma * lax.rsqrt(var + _BN_EPS)
        shift = beta - mean * scale
    else:
        y = _tiled_matmul(a, b, emit_stats=False)
        scale = jnp.ones((cout,), jnp.float32)
        shift = jnp.zeros((cout,), jnp.float32)

    mpad, npad = y.shape
    if use_bn or relu or residual is not None:
        sc = jnp.pad(scale, (0, npad - cout)).reshape(1, npad)
        sh = jnp.pad(shift, (0, npad - cout)).reshape(1, npad)
        res2 = None
        if residual is not None:
            res2 = jnp.pad(residual.reshape(m, cout),
                           ((0, mpad - m), (0, npad - cout)))
        y = _affine_residual_relu(y, sc, sh, res2, relu)
    return y[:m, :cout].reshape(n, ho, wo, cout)


# ----------------------------------------------------------------------------
# bilinear interpolation (glue, matches F.interpolate bilinear)
# ----------------------------------------------------------------------------
def _bilinear_resize(x, out_h, out_w, align_corners=False):
    n, h, w, c = x.shape
    if (h, w) == (out_h, out_w):
        return x

    def idx(out_size, in_size):
        o = jnp.arange(out_size, dtype=jnp.float32)
        if align_corners and out_size > 1:
            src = o * (in_size - 1) / (out_size - 1)
        else:
            src = (o + 0.5) * (in_size / out_size) - 0.5
            src = jnp.maximum(src, 0.0)
        i0 = jnp.clip(jnp.floor(src).astype(jnp.int32), 0, in_size - 1)
        i1 = jnp.clip(i0 + 1, 0, in_size - 1)
        frac = src - i0.astype(jnp.float32)
        return i0, i1, frac

    y0, y1, fy = idx(out_h, h)
    x0, x1, fx = idx(out_w, w)
    xy0 = x[:, y0]
    xy1 = x[:, y1]

    def wgather(t):
        return (t[:, :, x0] * (1.0 - fx)[None, None, :, None]
                + t[:, :, x1] * fx[None, None, :, None])

    top = wgather(xy0)
    bot = wgather(xy1)
    return top * (1.0 - fy)[None, :, None, None] + bot * fy[None, :, None, None]


# ----------------------------------------------------------------------------
# deterministic parameter initialization
# ----------------------------------------------------------------------------
class _Rng:
    def __init__(self, seed=0):
        self.key = jax.random.PRNGKey(seed)
        self.i = 0

    def next(self):
        self.i += 1
        return jax.random.fold_in(self.key, self.i)


def init_conv(rng, kh, kw, cin, cout):
    bound = 1.0 / math.sqrt(kh * kw * cin)
    return jax.random.uniform(rng.next(), (kh, kw, cin, cout), jnp.float32,
                              -bound, bound)


def init_bn(rng, c):
    del rng
    return {"gamma": jnp.ones((c,), jnp.float32),
            "beta": jnp.zeros((c,), jnp.float32)}


# ----------------------------------------------------------------------------
# HRNet building blocks (param trees + forward functions)
# ----------------------------------------------------------------------------
def init_bottleneck(rng, cin, cout, stride=1, downsample=False):
    p = {
        "conv1": init_conv(rng, 1, 1, cin, cout), "bn1": init_bn(rng, cout),
        "conv2": init_conv(rng, 3, 3, cout, cout), "bn2": init_bn(rng, cout),
        "conv3": init_conv(rng, 1, 1, cout, cout * 4), "bn3": init_bn(rng, cout * 4),
        "stride": stride, "downsample": downsample,
    }
    if downsample:
        p["conv_down"] = init_conv(rng, 1, 1, cin, cout * 4)
        p["bn_down"] = init_bn(rng, cout * 4)
    return p


def bottleneck_fwd(p, x):
    s = p["stride"]
    o = conv_bn_act(x, p["conv1"], p["bn1"]["gamma"], p["bn1"]["beta"], relu=True)
    o = conv_bn_act(o, p["conv2"], p["bn2"]["gamma"], p["bn2"]["beta"],
                    stride=s, padding=1, relu=True)
    residual = x
    if p["downsample"]:
        residual = conv_bn_act(x, p["conv_down"], p["bn_down"]["gamma"],
                               p["bn_down"]["beta"], stride=s)
    return conv_bn_act(o, p["conv3"], p["bn3"]["gamma"], p["bn3"]["beta"],
                       residual=residual, relu=True)


def init_basic(rng, cin, cout, stride=1, downsample=False):
    p = {
        "conv1": init_conv(rng, 3, 3, cin, cout), "bn1": init_bn(rng, cout),
        "conv2": init_conv(rng, 3, 3, cout, cout), "bn2": init_bn(rng, cout),
        "stride": stride, "downsample": downsample,
    }
    if downsample:
        p["conv_down"] = init_conv(rng, 1, 1, cin, cout)
        p["bn_down"] = init_bn(rng, cout)
    return p


def basic_fwd(p, x):
    s = p["stride"]
    o = conv_bn_act(x, p["conv1"], p["bn1"]["gamma"], p["bn1"]["beta"],
                    stride=s, padding=1, relu=True)
    residual = x
    if p["downsample"]:
        residual = conv_bn_act(x, p["conv_down"], p["bn_down"]["gamma"],
                               p["bn_down"]["beta"], stride=s)
    return conv_bn_act(o, p["conv2"], p["bn2"]["gamma"], p["bn2"]["beta"],
                       padding=1, residual=residual, relu=True)


def init_layer1(rng, cin, cout, num_blocks):
    return [init_bottleneck(rng, cin if i == 0 else cout * 4, cout,
                            stride=1, downsample=(i == 0))
            for i in range(num_blocks)]


def layer1_fwd(blocks, x):
    for b in blocks:
        x = bottleneck_fwd(b, x)
    return x


def init_transition(rng, in_chs, out_chs):
    items = []
    for i, oc in enumerate(out_chs):
        if i < len(in_chs):
            if in_chs[i] != oc:
                items.append({"type": "conv", "w": init_conv(rng, 3, 3, in_chs[i], oc),
                              "bn": init_bn(rng, oc), "stride": 1})
            else:
                items.append({"type": "id"})
        else:
            items.append({"type": "conv", "w": init_conv(rng, 3, 3, in_chs[-1], oc),
                          "bn": init_bn(rng, oc), "stride": 2})
    return items


def transition_fwd(items, xs):
    outs = []
    for idx, it in enumerate(items):
        x = xs[idx] if idx < len(xs) else xs[-1]
        if it["type"] == "id":
            outs.append(x)
        else:
            outs.append(conv_bn_act(x, it["w"], it["bn"]["gamma"], it["bn"]["beta"],
                                    stride=it["stride"], padding=1, relu=True))
    return outs


def init_branches(rng, num_blocks, in_chs, out_chs):
    return [[init_basic(rng, in_chs[i] if j == 0 else oc, oc)
             for j in range(num_blocks[i])]
            for i, oc in enumerate(out_chs)]


def branches_fwd(bl, xs):
    outs = []
    for i, x in enumerate(xs):
        for b in bl[i]:
            x = basic_fwd(b, x)
        outs.append(x)
    return outs


def init_fuse(rng, in_chs, out_chs, multi_scale_output=True):
    lists = []
    for i, oc in enumerate(out_chs):
        row = []
        for j, ic in enumerate(in_chs):
            if j > i:
                row.append({"type": "up", "w": init_conv(rng, 1, 1, ic, oc),
                            "bn": init_bn(rng, oc)})
            elif j == i:
                row.append({"type": "id"})
            else:
                seq = []
                pre = ic
                for k in range(i - j):
                    if k == i - j - 1:
                        seq.append({"w": init_conv(rng, 3, 3, pre, oc),
                                    "bn": init_bn(rng, oc), "relu": False})
                    else:
                        seq.append({"w": init_conv(rng, 3, 3, pre, out_chs[j]),
                                    "bn": init_bn(rng, out_chs[j]), "relu": True})
                        pre = out_chs[j]
                row.append({"type": "down", "seq": seq})
        lists.append(row)
    return {"lists": lists, "n_in": len(in_chs),
            "actual_out": len(out_chs) if multi_scale_output else 1}


def fuse_fwd(p, xs, align_corners=False):
    outs = []
    for i in range(p["actual_out"]):
        h, w = xs[i].shape[1], xs[i].shape[2]
        contributions = [xs[i]]
        for j in range(p["n_in"]):
            item = p["lists"][i][j]
            if item["type"] == "up":
                o = conv_bn_act(xs[j], item["w"], item["bn"]["gamma"], item["bn"]["beta"])
                contributions.append(_bilinear_resize(o, h, w, align_corners))
            elif item["type"] == "down":
                o = xs[j]
                for s in item["seq"]:
                    o = conv_bn_act(o, s["w"], s["bn"]["gamma"], s["bn"]["beta"],
                                    stride=2, padding=1, relu=s["relu"])
                contributions.append(o)
        outs.append(_sum_relu(*contributions))
    return outs


def init_hrmodule(rng, in_chs, out_chs, num_blocks, multi_scale_output=True):
    return {"branches": init_branches(rng, num_blocks, in_chs, out_chs),
            "fuse": init_fuse(rng, out_chs, out_chs, multi_scale_output)}


def hrmodule_fwd(p, xs, align_corners):
    return fuse_fwd(p["fuse"], branches_fwd(p["branches"], xs), align_corners)


def init_stage(rng, in_chs, out_chs, num_blocks, num_modules, multi_scale_output=True):
    mods = []
    for i in range(num_modules):
        ms = not (i == num_modules - 1 and (not multi_scale_output))
        mods.append(init_hrmodule(rng, in_chs, out_chs, num_blocks, ms))
    return mods


def stage_fwd(mods, xs, align_corners):
    for m in mods:
        xs = hrmodule_fwd(m, xs, align_corners)
    return xs


# ----------------------------------------------------------------------------
# HRNet
# ----------------------------------------------------------------------------
def init_hrnet(rng, cfg):
    p = {}
    p["conv1"] = init_conv(rng, 3, 3, cfg["input_channels"], 64)
    p["conv2"] = init_conv(rng, 3, 3, 64, 64)
    p["lay1"] = init_layer1(rng, 64, cfg["stage1_num_channels"][0],
                            cfg["stage1_num_blocks"][0])
    c1 = cfg["stage1_num_channels"][0] * 4
    p["tr1"] = init_transition(rng, [c1], cfg["stage2_num_channels"])
    p["stage2"] = init_stage(rng, cfg["stage2_num_channels"], cfg["stage2_num_channels"],
                             cfg["stage2_num_blocks"], cfg["stage2_num_modules"])
    p["tr2"] = init_transition(rng, cfg["stage2_num_channels"], cfg["stage3_num_channels"])
    p["stage3"] = init_stage(rng, cfg["stage3_num_channels"], cfg["stage3_num_channels"],
                             cfg["stage3_num_blocks"], cfg["stage3_num_modules"])
    p["tr3"] = init_transition(rng, cfg["stage3_num_channels"], cfg["stage4_num_channels"])
    p["stage4"] = init_stage(rng, cfg["stage4_num_channels"], cfg["stage4_num_channels"],
                             cfg["stage4_num_blocks"], cfg["stage4_num_modules"])
    return p


def hrnet_fwd(p, x_nchw, align_corners=False):
    x = jnp.transpose(x_nchw, (0, 2, 3, 1))  # NCHW -> NHWC
    # Stem: plain conv (no BN / ReLU), matching nn.Sequential(Conv2d) in the spec.
    o = conv_bn_act(x, p["conv1"], use_bn=False, stride=2, padding=1)
    o = conv_bn_act(o, p["conv2"], use_bn=False, stride=2, padding=1)
    o = layer1_fwd(p["lay1"], o)
    outs = transition_fwd(p["tr1"], [o])
    outs = stage_fwd(p["stage2"], outs, align_corners)
    outs = transition_fwd(p["tr2"], outs)
    outs = stage_fwd(p["stage3"], outs, align_corners)
    outs = transition_fwd(p["tr3"], outs)
    outs = stage_fwd(p["stage4"], outs, align_corners)
    h, w = outs[0].shape[1], outs[0].shape[2]
    x1 = _bilinear_resize(outs[1], h, w, align_corners)
    x2 = _bilinear_resize(outs[2], h, w, align_corners)
    x3 = _bilinear_resize(outs[3], h, w, align_corners)
    cat = jnp.concatenate([outs[0], x1, x2, x3], axis=-1)
    return [jnp.transpose(cat, (0, 3, 1, 2))]  # back to NCHW


# ----------------------------------------------------------------------------
if __name__ == "__main__":
    # Small-but-structurally-faithful HRNet config (constructor arguments of the
    # PyTorch module; defaults scaled down so the example runs quickly).
    cfg = dict(
        input_channels=3,
        stage1_num_modules=1, stage1_num_blocks=(2,), stage1_num_channels=(16,),
        stage2_num_modules=1, stage2_num_blocks=(1, 1), stage2_num_channels=(8, 16),
        stage3_num_modules=2, stage3_num_blocks=(1, 1, 1), stage3_num_channels=(8, 16, 32),
        stage4_num_modules=1, stage4_num_blocks=(1, 1, 1, 1), stage4_num_channels=(8, 16, 32, 64),
    )

    rng = _Rng(seed=0)
    params = init_hrnet(rng, cfg)

    key = jax.random.PRNGKey(0)
    x = jax.random.normal(key, (2, 3, 32, 32), dtype=jnp.float32)  # NCHW like PyTorch

    out = hrnet_fwd(params, x, align_corners=False)
    out = [jax.block_until_ready(o) for o in out]
    assert out[0].shape == (2, sum(cfg["stage4_num_channels"]), 8, 8)
    assert bool(jnp.all(jnp.isfinite(out[0])))
    print("KERNEL_OK")
</pallas_src>

<mosaic_0001>
module attributes {stable_mosaic.version = 11 : i64} {
  func.func @kernel(%arg0: i32, %arg1: i32, %arg2: i32, %arg3: memref<512x128xbf16, #tpu.memory_space<vmem>>, %arg4: memref<128x128xbf16, #tpu.memory_space<vmem>>, %arg5: memref<512x128xf32, #tpu.memory_space<vmem>>, %arg6: memref<512x128xf32, #tpu.memory_space<vmem>>) attributes {dimension_semantics = [#tpu.dimension_semantics<parallel>, #tpu.dimension_semantics<parallel>, #tpu.dimension_semantics<arbitrary>], iteration_bounds = array<i64: 1, 1, 1>, scalar_prefetch = 0 : i64, scratch_operands = 1 : i64, tpu.core_type = #tpu.core_type<tc>, window_params = [{transform_indices = @transform_0, window_bounds = array<i64: 512, 128>}, {transform_indices = @transform_1, window_bounds = array<i64: 128, 128>}, {transform_indices = @transform_2, window_bounds = array<i64: 512, 128>}]} {
    %c0_i32 = arith.constant 0 : i32
    %0 = arith.cmpi eq, %arg2, %c0_i32 : i32
    %1 = arith.extui %0 : i1 to i32
    %c0_i32_0 = arith.constant 0 : i32
    %2 = arith.cmpi ne, %1, %c0_i32_0 : i32
    scf.if %2 {
      %cst_10 = arith.constant 0.000000e+00 : f32
      %12 = vector.broadcast %cst_10 : f32 to vector<512x128xf32>
      %c0_11 = arith.constant 0 : index
      %c0_12 = arith.constant 0 : index
      %13 = vector.load %arg6[%c0_11, %c0_12] : memref<512x128xf32, #tpu.memory_space<vmem>>, vector<512x128xf32>
      tpu.vector_store %arg6[%c0_11, %c0_12], %12 {strides = array<i32>} : memref<512x128xf32, #tpu.memory_space<vmem>>, vector<512x128xf32>,
    } else {
    }
    %c0 = arith.constant 0 : index
    %c0_1 = arith.constant 0 : index
    %3 = vector.load %arg6[%c0, %c0_1] : memref<512x128xf32, #tpu.memory_space<vmem>>, vector<512x128xf32>
    %c0_2 = arith.constant 0 : index
    %c0_3 = arith.constant 0 : index
    %4 = vector.load %arg3[%c0_2, %c0_3] : memref<512x128xbf16, #tpu.memory_space<vmem>>, vector<512x128xbf16>
    %c0_4 = arith.constant 0 : index
    %c0_5 = arith.constant 0 : index
    %5 = vector.load %arg4[%c0_4, %c0_5] : memref<128x128xbf16, #tpu.memory_space<vmem>>, vector<128x128xbf16>
    %cst = arith.constant dense<0.000000e+00> : vector<512x128xf32>
    %6 = tpu.matmul %4, %5, %cst {dimension_numbers = #tpu.dot_dimension_numbers<[1], [0], [0], [1], [0, 0, 1, 1], [], []>} : vector<512x128xbf16>, vector<128x128xbf16>, vector<512x128xf32> -> vector<512x128xf32>
    %7 = arith.addf %3, %6 : vector<512x128xf32>
    %c0_6 = arith.constant 0 : index
    %c0_7 = arith.constant 0 : index
    %8 = vector.load %arg6[%c0_6, %c0_7] : memref<512x128xf32, #tpu.memory_space<vmem>>, vector<512x128xf32>
    tpu.vector_store %arg6[%c0_6, %c0_7], %7 {strides = array<i32>} : memref<512x128xf32, #tpu.memory_space<vmem>>, vector<512x128xf32>,
    %c0_i32_8 = arith.constant 0 : i32
    %9 = arith.cmpi eq, %arg2, %c0_i32_8 : i32
    %10 = arith.extui %9 : i1 to i32
    %c0_i32_9 = arith.constant 0 : i32
    %11 = arith.cmpi ne, %10, %c0_i32_9 : i32
    scf.if %11 {
      %c0_10 = arith.constant 0 : index
      %c0_11 = arith.constant 0 : index
      %12 = vector.load %arg6[%c0_10, %c0_11] : memref<512x128xf32, #tpu.memory_space<vmem>>, vector<512x128xf32>
      %c0_12 = arith.constant 0 : index
      %c0_13 = arith.constant 0 : index
      %13 = vector.load %arg5[%c0_12, %c0_13] : memref<512x128xf32, #tpu.memory_space<vmem>>, vector<512x128xf32>
      tpu.vector_store %arg5[%c0_12, %c0_13], %12 {strides = array<i32>} : memref<512x128xf32, #tpu.memory_space<vmem>>, vector<512x128xf32>,
    } else {
    }
    return
  }
  func.func @transform_0(%arg0: i32, %arg1: i32, %arg2: i32) -> (i32, i32) {
    %c0_i32 = arith.constant 0 : i32
    return %arg0, %arg2 : i32, i32
  }
  func.func @transform_1(%arg0: i32, %arg1: i32, %arg2: i32) -> (i32, i32) {
    %c0_i32 = arith.constant 0 : i32
    return %arg2, %arg1 : i32, i32
  }
  func.func @transform_2(%arg0: i32, %arg1: i32, %arg2: i32) -> (i32, i32) {
    %c0_i32 = arith.constant 0 : i32
    return %arg0, %arg1 : i32, i32
  }
}

</mosaic_0001>

<bundles_post_ra>
// kernel: _tiled_matmul.1
= control target key start
LH: loop header
LB: loop body
LE: loop exit
PB: predicated region body
PF: predicated region fallthrough
CT: control target
= control target key end

     0   :  { %s1304_s0 = inlined_call_operand.vmem [shape: bf16[512,128], index: 0, kind: input, shape index: {}]   ;;  %s1305_s1 = inlined_call_operand.vmem [shape: bf16[128,128], index: 1, kind: input, shape index: {}]   ;;  %s1306_s2 = inlined_call_operand.hbm [shape: f32[512,128], index: 2, kind: output, shape index: {}]  }
   0x1   :  { %v1109_v0 = vld [vmem:[%s1305_s1 + $0x38] sm:$0xff]  ;;  %v1108_v1 = vld [vmem:[%s1305_s1 + $0x30] sm:$0xff] }
   0x2   :  { %464 = vmatpush.bf16.msra.mxu0 %v1109_v0  ;;  %1110 = vmatpush.bf16.msra.mxu1 %v1109_v0 }
   0x3   :  { %1111 = vmatpush.bf16.msra.mxu2 %v1109_v0  ;;  %1112 = vmatpush.bf16.msra.mxu3 %v1109_v0 }
   0x4   :  { %7 = vsyncpa [#allocation4], 0  ;;  %v1107_v2 = vld [vmem:[%s1305_s1 + $0x28] sm:$0xff]  ;;  %v1106_v3 = vld [vmem:[%s1305_s1 + $0x20] sm:$0xff]  ;;  %s898_s5 = sshll.u32 %s1306_s2, 4  ;;  %s1164_s6 = smov 128   ;;  %s899_s5 = int_to_ptr.hbm [resolvable:$true] %s898_s5 }
   0x5   :  { %v1105_v4 = vld [vmem:[%s1305_s1 + $0x18] sm:$0xff]  ;;  %v1104_v5 = vld [vmem:[%s1305_s1 + $0x10] sm:$0xff]  ;;  %v1103_v6 = vld [vmem:[%s1305_s1 + $0x8] sm:$0xff]  ;;  %s1165_s7 = smov 8  }
   0x6   :  { %465 = vmatpush.bf16.msra.mxu0 %v1108_v1  ;;  %1113 = vmatpush.bf16.msra.mxu1 %v1108_v1  ;;  %v1102_v7 = vld [vmem:[%s1305_s1] sm:$0xff]  ;;  %v1071_v12 = vld [vmem:[%s1304_s0 + $0x8] sm:$0xff]  ;;  %v1072_v16 = vld [vmem:[%s1304_s0 + $0x10] sm:$0xff] }
   0x7   :  { %1114 = vmatpush.bf16.msra.mxu2 %v1108_v1  ;;  %1115 = vmatpush.bf16.msra.mxu3 %v1108_v1  ;;  %v1070_v8 = vld [vmem:[%s1304_s0] sm:$0xff]  ;;  %v1079_v13 = vld [vmem:[%s1304_s0 + $0x48] sm:$0xff]  ;;  %v1080_v17 = vld [vmem:[%s1304_s0 + $0x50] sm:$0xff] }
   0x8   :  { %v1078_v9 = vld [vmem:[%s1304_s0 + $0x40] sm:$0xff]  ;;  %v1087_v14 = vld [vmem:[%s1304_s0 + $0x88] sm:$0xff]  ;;  %v1088_v18 = vld [vmem:[%s1304_s0 + $0x90] sm:$0xff] }
   0x9   :  { %v1086_v10 = vld [vmem:[%s1304_s0 + $0x80] sm:$0xff]  ;;  %v1095_v15 = vld [vmem:[%s1304_s0 + $0xc8] sm:$0xff]  ;;  %v1096_v19 = vld [vmem:[%s1304_s0 + $0xd0] sm:$0xff] }
   0xa   :  { %466 = vmatpush.bf16.msra.mxu0 %v1107_v2  ;;  %1116 = vmatpush.bf16.msra.mxu1 %v1107_v2  ;;  %v1094_v11 = vld [vmem:[%s1304_s0 + $0xc0] sm:$0xff]  ;;  %v1073_v20 = vld [vmem:[%s1304_s0 + $0x18] sm:$0xff]  ;;  %v1075_v28 = vld [vmem:[%s1304_s0 + $0x28] sm:$0xff] }
   0xb   :  { %1117 = vmatpush.bf16.msra.mxu2 %v1107_v2  ;;  %1118 = vmatpush.bf16.msra.mxu3 %v1107_v2  ;;  %v1081_v21 = vld [vmem:[%s1304_s0 + $0x58] sm:$0xff]  ;;  %v1074_v24 = vld [vmem:[%s1304_s0 + $0x20] sm:$0xff]  ;;  %v1083_v29 = vld [vmem:[%s1304_s0 + $0x68] sm:$0xff] }
   0xc   :  { %v1089_v22 = vld [vmem:[%s1304_s0 + $0x98] sm:$0xff]  ;;  %v1082_v25 = vld [vmem:[%s1304_s0 + $0x60] sm:$0xff]  ;;  %v1091_v30 = vld [vmem:[%s1304_s0 + $0xa8] sm:$0xff] }
   0xd   :  { %v1097_v23 = vld [vmem:[%s1304_s0 + $0xd8] sm:$0xff]  ;;  %v1090_v26 = vld [vmem:[%s1304_s0 + $0xa0] sm:$0xff]  ;;  %v1099_v31 = vld [vmem:[%s1304_s0 + $0xe8] sm:$0xff] }
   0xe   :  { %467 = vmatpush.bf16.msra.mxu0 %v1106_v3  ;;  %1119 = vmatpush.bf16.msra.mxu1 %v1106_v3  ;;  %v1098_v27 = vld [vmem:[%s1304_s0 + $0xe0] sm:$0xff]  ;;  %v1076_v32 = vld [vmem:[%s1304_s0 + $0x30] sm:$0xff]  ;;  %v1077_v36 = vld [vmem:[%s1304_s0 + $0x38] sm:$0xff] }
   0xf   :  { %1120 = vmatpush.bf16.msra.mxu2 %v1106_v3  ;;  %1121 = vmatpush.bf16.msra.mxu3 %v1106_v3  ;;  %v1084_v33 = vld [vmem:[%s1304_s0 + $0x70] sm:$0xff]  ;;  %v1085_v37 = vld [vmem:[%s1304_s0 + $0x78] sm:$0xff] }
  0x10   :  { %v1092_v34 = vld [vmem:[%s1304_s0 + $0xb0] sm:$0xff]  ;;  %v1093_v38 = vld [vmem:[%s1304_s0 + $0xb8] sm:$0xff] }
  0x11   :  { %v1100_v35 = vld [vmem:[%s1304_s0 + $0xf0] sm:$0xff]  ;;  %v1101_v39 = vld [vmem:[%s1304_s0 + $0xf8] sm:$0xff]  ;;  %s1163_s0 = smov [#allocation3]  }
  0x12   :  { %468 = vmatpush.bf16.msra.mxu0 %v1105_v4  ;;  %1122 = vmatpush.bf16.msra.mxu1 %v1105_v4  ;;  %s896_s3 = sshll.u32 %s1163_s0, 4  ;;  %s897_s3 = int_to_ptr.vmem [resolvable:$true] %s896_s3 }
  0x13   :  { %1123 = vmatpush.bf16.msra.mxu2 %v1105_v4  ;;  %1124 = vmatpush.bf16.msra.mxu3 %v1105_v4 }
  0x16   :  { %469 = vmatpush.bf16.msra.mxu0 %v1104_v5  ;;  %1125 = vmatpush.bf16.msra.mxu1 %v1104_v5 }
  0x17   :  { %1126 = vmatpush.bf16.msra.mxu2 %v1104_v5  ;;  %1127 = vmatpush.bf16.msra.mxu3 %v1104_v5 }
  0x1a   :  { %470 = vmatpush.bf16.msra.mxu0 %v1103_v6  ;;  %1128 = vmatpush.bf16.msra.mxu1 %v1103_v6 }
  0x1b   :  { %1129 = vmatpush.bf16.msra.mxu2 %v1103_v6  ;;  %1130 = vmatpush.bf16.msra.mxu3 %v1103_v6 }
  0x1e   :  { %471 = vmatpush.bf16.msra.mxu0 %v1102_v7  ;;  %1131 = vmatpush.bf16.msra.mxu1 %v1102_v7 }
  0x1f   :  { %1132 = vmatpush.bf16.msra.mxu2 %v1102_v7  ;;  %1133 = vmatpush.bf16.msra.mxu3 %v1102_v7 }
  0x21   :  { %472 = vmatmul.bf16.vlgmr.msra.gmra.mxu0 %v1070_v8  ;;  %512 = vmatmul.bf16.vlgmr.msra.gmra.mxu1 %v1078_v9 }
  0x22   :  { %552 = vmatmul.bf16.vlgmr.msra.gmra.mxu2 %v1086_v10  ;;  %592 = vmatmul.bf16.vlgmr.msra.gmra.mxu3 %v1094_v11 }
  0x31   :  { %477 = vmatmul.bf16.gmra.mxu0 %v1071_v12  ;;  %517 = vmatmul.bf16.gmra.mxu1 %v1079_v13 }
  0x32   :  { %557 = vmatmul.bf16.gmra.mxu2 %v1087_v14  ;;  %597 = vmatmul.bf16.gmra.mxu3 %v1095_v15 }
  0x41   :  { %482 = vmatmul.bf16.gmra.mxu0 %v1072_v16  ;;  %522 = vmatmul.bf16.gmra.mxu1 %v1080_v17 }
  0x42   :  { %562 = vmatmul.bf16.gmra.mxu2 %v1088_v18  ;;  %602 = vmatmul.bf16.gmra.mxu3 %v1096_v19 }
  0x51   :  { %487 = vmatmul.bf16.gmra.mxu0 %v1073_v20  ;;  %527 = vmatmul.bf16.gmra.mxu1 %v1081_v21 }
  0x52   :  { %567 = vmatmul.bf16.gmra.mxu2 %v1089_v22  ;;  %607 = vmatmul.bf16.gmra.mxu3 %v1097_v23 }
  0x61   :  { %492 = vmatmul.bf16.gmra.mxu0 %v1074_v24  ;;  %532 = vmatmul.bf16.gmra.mxu1 %v1082_v25 }
  0x62   :  { %572 = vmatmul.bf16.gmra.mxu2 %v1090_v26  ;;  %612 = vmatmul.bf16.gmra.mxu3 %v1098_v27 }
  0x71   :  { %497 = vmatmul.bf16.gmra.mxu0 %v1075_v28  ;;  %537 = vmatmul.bf16.gmra.mxu1 %v1083_v29 }
  0x72   :  { %577 = vmatmul.bf16.gmra.mxu2 %v1091_v30  ;;  %617 = vmatmul.bf16.gmra.mxu3 %v1099_v31 }
  0x81   :  { %502 = vmatmul.bf16.gmra.mxu0 %v1076_v32  ;;  %542 = vmatmul.bf16.gmra.mxu1 %v1084_v33 }
  0x82   :  { %582 = vmatmul.bf16.gmra.mxu2 %v1092_v34  ;;  %622 = vmatmul.bf16.gmra.mxu3 %v1100_v35 }
  0x91   :  { %507 = vmatmul.bf16.gmra.mxu0 %v1077_v36  ;;  %547 = vmatmul.bf16.gmra.mxu1 %v1085_v37 }
  0x92   :  { %587 = vmatmul.bf16.gmra.mxu2 %v1093_v38  ;;  %627 = vmatmul.bf16.gmra.mxu3 %v1101_v39 }
  0x9e   :  { %v473_v40 = vpop.f32.mrf.mxu0  ;;  %v513_v41 = vpop.f32.mrf.mxu1 }
  0x9f   :  { %828 = vst [vmem:[#allocation3] sm:$0xff] %v473_v40 }
  0xa0   :  { %844 = vst [vmem:[#allocation3 + $0x80] sm:$0xff] %v513_v41 }
  0xa5   :  { %v553_v42 = vpop.f32.mrf.mxu2  ;;  %v593_v43 = vpop.f32.mrf.mxu3 }
  0xa6   :  { %860 = vst [vmem:[#allocation3 + $0x100] sm:$0xff] %v553_v42  ;;  %v475_v44 = vpop.f32.mrf.mxu0  ;;  %v515_v45 = vpop.f32.mrf.mxu1 }
  0xa7   :  { %876 = vst [vmem:[#allocation3 + $0x180] sm:$0xff] %v593_v43 }
  0xa8   :  { %829 = vst [vmem:[#allocation3 + $0x8] sm:$0xff] %v475_v44 }
  0xa9   :  { %845 = vst [vmem:[#allocation3 + $0x88] sm:$0xff] %v515_v45 }
  0xad   :  { %v555_v46 = vpop.f32.mrf.mxu2  ;;  %v595_v47 = vpop.f32.mrf.mxu3 }
  0xae   :  { %861 = vst [vmem:[#allocation3 + $0x108] sm:$0xff] %v555_v46  ;;  %v478_v48 = vpop.f32.mrf.mxu0  ;;  %v518_v49 = vpop.f32.mrf.mxu1 }
  0xaf   :  { %877 = vst [vmem:[#allocation3 + $0x188] sm:$0xff] %v595_v47 }
  0xb0   :  { %830 = vst [vmem:[#allocation3 + $0x10] sm:$0xff] %v478_v48 }
  0xb1   :  { %846 = vst [vmem:[#allocation3 + $0x90] sm:$0xff] %v518_v49 }
  0xb5   :  { %v558_v50 = vpop.f32.mrf.mxu2  ;;  %v598_v51 = vpop.f32.mrf.mxu3 }
  0xb6   :  { %862 = vst [vmem:[#allocation3 + $0x110] sm:$0xff] %v558_v50  ;;  %v480_v52 = vpop.f32.mrf.mxu0  ;;  %v520_v53 = vpop.f32.mrf.mxu1 }
  0xb7   :  { %878 = vst [vmem:[#allocation3 + $0x190] sm:$0xff] %v598_v51 }
  0xb8   :  { %831 = vst [vmem:[#allocation3 + $0x18] sm:$0xff] %v480_v52 }
  0xb9   :  { %847 = vst [vmem:[#allocation3 + $0x98] sm:$0xff] %v520_v53 }
  0xbd   :  { %v560_v54 = vpop.f32.mrf.mxu2  ;;  %v600_v55 = vpop.f32.mrf.mxu3 }
  0xbe   :  { %863 = vst [vmem:[#allocation3 + $0x118] sm:$0xff] %v560_v54  ;;  %v483_v56 = vpop.f32.mrf.mxu0  ;;  %v523_v57 = vpop.f32.mrf.mxu1 }
  0xbf   :  { %879 = vst [vmem:[#allocation3 + $0x198] sm:$0xff] %v600_v55 }
  0xc0   :  { %832 = vst [vmem:[#allocation3 + $0x20] sm:$0xff] %v483_v56 }
  0xc1   :  { %848 = vst [vmem:[#allocation3 + $0xa0] sm:$0xff] %v523_v57 }
  0xc5   :  { %v563_v58 = vpop.f32.mrf.mxu2  ;;  %v603_v59 = vpop.f32.mrf.mxu3 }
  0xc6   :  { %864 = vst [vmem:[#allocation3 + $0x120] sm:$0xff] %v563_v58  ;;  %v485_v60 = vpop.f32.mrf.mxu0  ;;  %v525_v61 = vpop.f32.mrf.mxu1 }
  0xc7   :  { %880 = vst [vmem:[#allocation3 + $0x1a0] sm:$0xff] %v603_v59 }
  0xc8   :  { %833 = vst [vmem:[#allocation3 + $0x28] sm:$0xff] %v485_v60 }
  0xc9   :  { %849 = vst [vmem:[#allocation3 + $0xa8] sm:$0xff] %v525_v61 }
  0xcd   :  { %v565_v62 = vpop.f32.mrf.mxu2  ;;  %v605_v63 = vpop.f32.mrf.mxu3 }
  0xce   :  { %865 = vst [vmem:[#allocation3 + $0x128] sm:$0xff] %v565_v62  ;;  %v488_v0 = vpop.f32.mrf.mxu0  ;;  %v528_v1 = vpop.f32.mrf.mxu1 }
  0xcf   :  { %881 = vst [vmem:[#allocation3 + $0x1a8] sm:$0xff] %v605_v63 }
  0xd0   :  { %834 = vst [vmem:[#allocation3 + $0x30] sm:$0xff] %v488_v0 }
  0xd1   :  { %850 = vst [vmem:[#allocation3 + $0xb0] sm:$0xff] %v528_v1 }
  0xd5   :  { %v568_v2 = vpop.f32.mrf.mxu2  ;;  %v608_v3 = vpop.f32.mrf.mxu3 }
  0xd6   :  { %866 = vst [vmem:[#allocation3 + $0x130] sm:$0xff] %v568_v2  ;;  %v490_v4 = vpop.f32.mrf.mxu0  ;;  %v530_v5 = vpop.f32.mrf.mxu1 }
  0xd7   :  { %882 = vst [vmem:[#allocation3 + $0x1b0] sm:$0xff] %v608_v3 }
  0xd8   :  { %835 = vst [vmem:[#allocation3 + $0x38] sm:$0xff] %v490_v4 }
  0xd9   :  { %851 = vst [vmem:[#allocation3 + $0xb8] sm:$0xff] %v530_v5 }
  0xdd   :  { %v570_v6 = vpop.f32.mrf.mxu2  ;;  %v610_v7 = vpop.f32.mrf.mxu3 }
  0xde   :  { %867 = vst [vmem:[#allocation3 + $0x138] sm:$0xff] %v570_v6  ;;  %v493_v8 = vpop.f32.mrf.mxu0  ;;  %v533_v9 = vpop.f32.mrf.mxu1 }
  0xdf   :  { %883 = vst [vmem:[#allocation3 + $0x1b8] sm:$0xff] %v610_v7 }
  0xe0   :  { %836 = vst [vmem:[#allocation3 + $0x40] sm:$0xff] %v493_v8 }
  0xe1   :  { %852 = vst [vmem:[#allocation3 + $0xc0] sm:$0xff] %v533_v9 }
  0xe5   :  { %v573_v10 = vpop.f32.mrf.mxu2  ;;  %v613_v11 = vpop.f32.mrf.mxu3 }
  0xe6   :  { %868 = vst [vmem:[#allocation3 + $0x140] sm:$0xff] %v573_v10  ;;  %v495_v12 = vpop.f32.mrf.mxu0  ;;  %v535_v13 = vpop.f32.mrf.mxu1 }
  0xe7   :  { %884 = vst [vmem:[#allocation3 + $0x1c0] sm:$0xff] %v613_v11 }
  0xe8   :  { %837 = vst [vmem:[#allocation3 + $0x48] sm:$0xff] %v495_v12 }
  0xe9   :  { %853 = vst [vmem:[#allocation3 + $0xc8] sm:$0xff] %v535_v13 }
  0xed   :  { %v575_v14 = vpop.f32.mrf.mxu2  ;;  %v615_v15 = vpop.f32.mrf.mxu3 }
  0xee   :  { %869 = vst [vmem:[#allocation3 + $0x148] sm:$0xff] %v575_v14  ;;  %v498_v16 = vpop.f32.mrf.mxu0  ;;  %v538_v17 = vpop.f32.mrf.mxu1 }
  0xef   :  { %885 = vst [vmem:[#allocation3 + $0x1c8] sm:$0xff] %v615_v15 }
  0xf0   :  { %838 = vst [vmem:[#allocation3 + $0x50] sm:$0xff] %v498_v16 }
  0xf1   :  { %854 = vst [vmem:[#allocation3 + $0xd0] sm:$0xff] %v538_v17 }
  0xf5   :  { %v578_v18 = vpop.f32.mrf.mxu2  ;;  %v618_v19 = vpop.f32.mrf.mxu3 }
  0xf6   :  { %870 = vst [vmem:[#allocation3 + $0x150] sm:$0xff] %v578_v18  ;;  %v500_v20 = vpop.f32.mrf.mxu0  ;;  %v540_v21 = vpop.f32.mrf.mxu1 }
  0xf7   :  { %886 = vst [vmem:[#allocation3 + $0x1d0] sm:$0xff] %v618_v19 }
  0xf8   :  { %839 = vst [vmem:[#allocation3 + $0x58] sm:$0xff] %v500_v20 }
  0xf9   :  { %855 = vst [vmem:[#allocation3 + $0xd8] sm:$0xff] %v540_v21 }
  0xfd   :  { %v580_v22 = vpop.f32.mrf.mxu2  ;;  %v620_v23 = vpop.f32.mrf.mxu3 }
  0xfe   :  { %871 = vst [vmem:[#allocation3 + $0x158] sm:$0xff] %v580_v22  ;;  %v503_v24 = vpop.f32.mrf.mxu0  ;;  %v543_v25 = vpop.f32.mrf.mxu1 }
  0xff   :  { %887 = vst [vmem:[#allocation3 + $0x1d8] sm:$0xff] %v620_v23 }
 0x100   :  { %840 = vst [vmem:[#allocation3 + $0x60] sm:$0xff] %v503_v24 }
 0x101   :  { %856 = vst [vmem:[#allocation3 + $0xe0] sm:$0xff] %v543_v25 }
 0x105   :  { %v583_v26 = vpop.f32.mrf.mxu2  ;;  %v623_v27 = vpop.f32.mrf.mxu3 }
 0x106   :  { %872 = vst [vmem:[#allocation3 + $0x160] sm:$0xff] %v583_v26  ;;  %v505_v28 = vpop.f32.mrf.mxu0  ;;  %v545_v29 = vpop.f32.mrf.mxu1 }
 0x107   :  { %888 = vst [vmem:[#allocation3 + $0x1e0] sm:$0xff] %v623_v27 }
 0x108   :  { %841 = vst [vmem:[#allocation3 + $0x68] sm:$0xff] %v505_v28 }
 0x109   :  { %857 = vst [vmem:[#allocation3 + $0xe8] sm:$0xff] %v545_v29 }
 0x10d   :  { %v585_v30 = vpop.f32.mrf.mxu2  ;;  %v625_v31 = vpop.f32.mrf.mxu3 }
 0x10e   :  { %873 = vst [vmem:[#allocation3 + $0x168] sm:$0xff] %v585_v30  ;;  %v508_v32 = vpop.f32.mrf.mxu0  ;;  %v548_v33 = vpop.f32.mrf.mxu1 }
 0x10f   :  { %889 = vst [vmem:[#allocation3 + $0x1e8] sm:$0xff] %v625_v31 }
 0x110   :  { %842 = vst [vmem:[#allocation3 + $0x70] sm:$0xff] %v508_v32 }
 0x111   :  { %858 = vst [vmem:[#allocation3 + $0xf0] sm:$0xff] %v548_v33 }
 0x115   :  { %v588_v34 = vpop.f32.mrf.mxu2  ;;  %v628_v35 = vpop.f32.mrf.mxu3 }
 0x116   :  { %874 = vst [vmem:[#allocation3 + $0x170] sm:$0xff] %v588_v34  ;;  %v510_v36 = vpop.f32.mrf.mxu0  ;;  %v550_v37 = vpop.f32.mrf.mxu1 }
 0x117   :  { %890 = vst [vmem:[#allocation3 + $0x1f0] sm:$0xff] %v628_v35 }
 0x118   :  { %843 = vst [vmem:[#allocation3 + $0x78] sm:$0xff] %v510_v36 }
 0x119   :  { %859 = vst [vmem:[#allocation3 + $0xf8] sm:$0xff] %v550_v37 }
 0x11d   :  { %v590_v38 = vpop.f32.mrf.mxu2  ;;  %v630_v39 = vpop.f32.mrf.mxu3 }
 0x11e   :  { %875 = vst [vmem:[#allocation3 + $0x178] sm:$0xff] %v590_v38 }
 0x11f   :  { %891 = vst [vmem:[#allocation3 + $0x1f8] sm:$0xff] %v630_v39 }
 0x120   :  { %904 = dma.vmem_to_hbm [thread:$0]  %s897_s3, 8192, %s899_s5, [#allocation4], %s1164_s6, %s1164_s6, %s1165_s7  }
 0x121   :  { %1161 = dma.done.wait [#allocation4], 8192  }
 0x122   :  { %1162 = vsyncadd [#allocation4], 4294959104 }
 0x123   :  { %909 = vsyncpa [#allocation4], 1 }

</bundles_post_ra>
